<compile_context>
chip_gen: v5e
topology: v5e:2x2
jax: 0.10.0
libtpu: 0.0.40
codegen_flags: <defaults>
</compile_context>

<pallas_src>
import functools

import jax
import jax.numpy as jnp
from jax.experimental import pallas as pl
from jax.experimental.pallas import tpu as pltpu


def _round_up(n: int, m: int) -> int:
    return ((n + m - 1) // m) * m


def _sublane_multiple(*dtypes) -> int:
    """Packed-sublane multiple: 8 for 4-byte, 16 for 2-byte, 32 for 1-byte."""
    m = 8
    for dt in dtypes:
        isz = jnp.dtype(dt).itemsize
        m = max(m, 8 if isz >= 4 else (16 if isz == 2 else 32))
    return m


@functools.lru_cache(maxsize=None)
def _vmem_budget_bytes() -> int:
    """~3/4 of per-core VMEM: ~48 MiB on v7x (64 MiB/TC), ~96 MiB on v5e/v6e."""
    try:
        cap = int(pltpu.get_tpu_info().vmem_capacity_bytes)
    except Exception:
        cap = 64 * 1024 * 1024          # conservative (v7x-sized) fallback
    return max(16 * 1024 * 1024, (cap * 3) // 4)


def fnn_kernel(x_ref, w1_ref, b1_ref, w2_ref, b2_ref, o_ref):
    # Cast x to the MXU compute dtype in VMEM (no extra HBM copy of x).
    x = x_ref[...].astype(w1_ref.dtype)
    # fc1 on the MXU -> f32 accumulator; bias + ReLU on the f32 accumulator (VPU).
    h = jnp.dot(x, w1_ref[...], preferred_element_type=jnp.float32)
    h = jnp.maximum(h + b1_ref[...], 0.0)          # b1 is (1, Hp) -> broadcasts over rows
    # fc2 on the MXU: operands in the compute dtype, f32 accumulation.
    y = jnp.dot(h.astype(w2_ref.dtype), w2_ref[...],
                preferred_element_type=jnp.float32)
    o_ref[...] = (y + b2_ref[...]).astype(o_ref.dtype)


def prepare_params(w1, b1, w2, b2, *, compute_dtype=jnp.bfloat16):
    """One-time (init-time) prep: pad hidden/output lanes to 128 and cast the
    weights to the MXU compute dtype.  Biases stay f32 (added on the f32
    accumulator inside the kernel).  Zero padding is exact for the matmuls."""
    input_size, hidden_size = w1.shape
    hidden2, output_size = w2.shape
    assert hidden2 == hidden_size and b1.shape == (hidden_size,) and b2.shape == (output_size,)
    Hp = _round_up(hidden_size, 128)
    Op = _round_up(output_size, 128)
    cdtype = jnp.dtype(compute_dtype)
    w1p = jnp.zeros((input_size, Hp), cdtype).at[:, :hidden_size].set(w1.astype(cdtype))
    w2p = jnp.zeros((Hp, Op), cdtype).at[:hidden_size, :output_size].set(w2.astype(cdtype))
    b1p = jnp.zeros((1, Hp), jnp.float32).at[0, :hidden_size].set(b1.astype(jnp.float32))
    b2p = jnp.zeros((1, Op), jnp.float32).at[0, :output_size].set(b2.astype(jnp.float32))
    return w1p, b1p, w2p, b2p, output_size


@functools.partial(jax.jit, static_argnames=("output_size", "tm_max"))
def net_fnn_forward(x, w1p, b1p, w2p, b2p, *, output_size, tm_max=1024):
    """x: (B, ...) arbitrary trailing dims; returns (B, output_size, 1)."""
    B = x.shape[0]
    x2d = x.reshape(B, -1)                       # x.view(x.size(0), -1) -- free reshape
    out_dtype = x2d.dtype
    K = x2d.shape[1]
    Kw, Hp = w1p.shape
    Hp2, Op = w2p.shape
    assert Kw == K, (Kw, K)
    assert Hp2 == Hp and output_size <= Op

    xbytes = jnp.dtype(x2d.dtype).itemsize
    cbytes = jnp.dtype(w1p.dtype).itemsize
    obytes = jnp.dtype(out_dtype).itemsize
    sub = _sublane_multiple(x2d.dtype, w1p.dtype)

    # ---- batch tile sizing from the per-chip VMEM budget ----------------------
    budget = _vmem_budget_bytes()
    weight_vmem = 2 * (K * Hp + Hp * Op) * cbytes + 2 * (Hp + Op) * 4
    per_row = 2 * (K * xbytes + Op * obytes) + (Hp + Op) * 4   # dbl-buffered tiles + f32 temps
    avail = budget - weight_vmem - (4 << 20)                   # headroom for Mosaic scratch
    tm_cap = max(sub, (avail // max(per_row, 1)) // sub * sub) if avail > 0 else sub

    if B <= sub:
        tm = B                           # single tiny tile (block dim == full array dim)
    else:
        target_steps = 2 if B < 64 else 4    # >=2: v7x megacore; >=4: overlap x DMA
        tm = _round_up(pl.cdiv(B, target_steps), sub)
        tm = max(sub, min(tm, tm_cap, tm_max))
    grid = (pl.cdiv(B, tm),)             # ragged last tile OK: OOB output rows are dropped

    cost = pl.CostEstimate(
        flops=2 * B * (K * Hp + Hp * Op),
        transcendentals=0,
        bytes_accessed=(B * K * xbytes + (K * Hp + Hp * Op) * cbytes
                        + (Hp + Op) * 4 + B * Op * obytes),
    )

    out_padded = pl.pallas_call(
        fnn_kernel,
        out_shape=jax.ShapeDtypeStruct((B, Op), out_dtype),
        grid=grid,
        in_specs=[
            pl.BlockSpec((tm, K), lambda i: (i, 0)),     # x tile   (pipelined, full-K)
            pl.BlockSpec((K, Hp), lambda i: (0, 0)),     # W1       (resident)
            pl.BlockSpec((1, Hp), lambda i: (0, 0)),     # b1       (resident)
            pl.BlockSpec((Hp, Op), lambda i: (0, 0)),    # W2       (resident)
            pl.BlockSpec((1, Op), lambda i: (0, 0)),     # b2       (resident)
        ],
        out_specs=pl.BlockSpec((tm, Op), lambda i: (i, 0)),   # lane-dense store
        compiler_params=pltpu.CompilerParams(
            dimension_semantics=("parallel",),
            vmem_limit_bytes=int(budget),
        ),
        cost_estimate=cost,
    )(x2d, w1p, b1p, w2p, b2p)

    out2d = out_padded[:, :output_size]          # drop lane padding
    return out2d[..., None]                      # x.unsqueeze(-1)  (free reshape)


def init_params(key, input_size, hidden_size, output_size, dtype=jnp.float32):
    """Deterministic init matching torch.nn.Linear's U(-1/sqrt(fan_in), 1/sqrt(fan_in))."""
    k1, k2, k3, k4 = jax.random.split(key, 4)
    bound1 = 1.0 / jnp.sqrt(input_size)
    bound2 = 1.0 / jnp.sqrt(hidden_size)
    # stored transposed vs torch ((in, out) instead of (out, in)) for x @ W
    w1 = jax.random.uniform(k1, (input_size, hidden_size), dtype, -bound1, bound1)
    b1 = jax.random.uniform(k2, (hidden_size,), dtype, -bound1, bound1)
    w2 = jax.random.uniform(k3, (hidden_size, output_size), dtype, -bound2, bound2)
    b2 = jax.random.uniform(k4, (output_size,), dtype, -bound2, bound2)
    return w1, b1, w2, b2


if __name__ == "__main__":
    key = jax.random.PRNGKey(0)
    kx, kp, kx2 = jax.random.split(key, 3)

    # small shapes: batch=2, input presented as (B, C, H, W)=(2, 4, 8, 8)
    # -> input_size = 4*8*8 = 256, hidden_size = 32, output_size = 16
    B, C, H, W = 2, 4, 8, 8
    input_size, hidden_size, output_size = C * H * W, 32, 16

    x = jax.random.normal(kx, (B, C, H, W), dtype=jnp.float32)
    w1, b1, w2, b2 = init_params(kp, input_size, hidden_size, output_size)

    # reference in plain JAX
    x2d = x.reshape(B, -1)
    ref = (jnp.maximum(x2d @ w1 + b1, 0.0) @ w2 + b2)[..., None]

    # f32 compute path (exact vs reference)
    w1p, b1p, w2p, b2p, osz = prepare_params(w1, b1, w2, b2, compute_dtype=jnp.float32)
    out = jax.block_until_ready(net_fnn_forward(x, w1p, b1p, w2p, b2p, output_size=osz))
    assert out.shape == (B, output_size, 1), out.shape
    assert jnp.allclose(out, ref, atol=1e-5, rtol=1e-5)

    # default bf16 MXU path (f32 accumulation) -- looser tolerance
    w1b, b1b, w2b, b2b, osz = prepare_params(w1, b1, w2, b2)   # bfloat16 default
    out_bf16 = jax.block_until_ready(net_fnn_forward(x, w1b, b1b, w2b, b2b, output_size=osz))
    assert out_bf16.shape == (B, output_size, 1), out_bf16.shape
    assert jnp.allclose(out_bf16, ref, atol=1e-1, rtol=1e-1)

    # larger batch: exercises the multi-step (megacore-shardable) grid with a
    # ragged last tile and no HBM batch padding.
    B2 = 50
    xb = jax.random.normal(kx2, (B2, C, H, W), dtype=jnp.float32)
    refb = (jnp.maximum(xb.reshape(B2, -1) @ w1 + b1, 0.0) @ w2 + b2)[..., None]
    outb = jax.block_until_ready(net_fnn_forward(xb, w1b, b1b, w2b, b2b, output_size=osz))
    assert outb.shape == (B2, output_size, 1), outb.shape
    assert jnp.allclose(outb, refb, atol=1e-1, rtol=1e-1)

    print("KERNEL_OK")
</pallas_src>

<mosaic_0001>
module attributes {stable_mosaic.version = 11 : i64} {
  func.func @fnn_kernel(%arg0: i32, %arg1: memref<2x256xf32, #tpu.memory_space<vmem>>, %arg2: memref<256x128xf32, #tpu.memory_space<vmem>>, %arg3: memref<1x128xf32, #tpu.memory_space<vmem>>, %arg4: memref<128x128xf32, #tpu.memory_space<vmem>>, %arg5: memref<1x128xf32, #tpu.memory_space<vmem>>, %arg6: memref<2x128xf32, #tpu.memory_space<vmem>>) attributes {dimension_semantics = [#tpu.dimension_semantics<parallel>], iteration_bounds = array<i64: 1>, scalar_prefetch = 0 : i64, scratch_operands = 0 : i64, tpu.core_type = #tpu.core_type<tc>, window_params = [{transform_indices = @transform_0, window_bounds = array<i64: 2, 256>}, {pipeline_mode = #tpu.pipeline_mode<synchronous>, transform_indices = @transform_1, window_bounds = array<i64: 256, 128>}, {pipeline_mode = #tpu.pipeline_mode<synchronous>, transform_indices = @transform_2, window_bounds = array<i64: 1, 128>}, {pipeline_mode = #tpu.pipeline_mode<synchronous>, transform_indices = @transform_3, window_bounds = array<i64: 128, 128>}, {pipeline_mode = #tpu.pipeline_mode<synchronous>, transform_indices = @transform_4, window_bounds = array<i64: 1, 128>}, {transform_indices = @transform_5, window_bounds = array<i64: 2, 128>}]} {
    %c0 = arith.constant 0 : index
    %c0_0 = arith.constant 0 : index
    %0 = vector.load %arg1[%c0, %c0_0] : memref<2x256xf32, #tpu.memory_space<vmem>>, vector<2x256xf32>
    %c0_1 = arith.constant 0 : index
    %c0_2 = arith.constant 0 : index
    %1 = vector.load %arg2[%c0_1, %c0_2] : memref<256x128xf32, #tpu.memory_space<vmem>>, vector<256x128xf32>
    %cst = arith.constant dense<0.000000e+00> : vector<2x128xf32>
    %2 = tpu.matmul %0, %1, %cst {dimension_numbers = #tpu.dot_dimension_numbers<[1], [0], [0], [1], [0, 0, 1, 1], [], []>} : vector<2x256xf32>, vector<256x128xf32>, vector<2x128xf32> -> vector<2x128xf32>
    %c0_3 = arith.constant 0 : index
    %c0_4 = arith.constant 0 : index
    %3 = vector.load %arg3[%c0_3, %c0_4] : memref<1x128xf32, #tpu.memory_space<vmem>>, vector<1x128xf32>
    %4 = vector.broadcast %3 : vector<1x128xf32> to vector<2x128xf32>
    %5 = arith.addf %2, %4 : vector<2x128xf32>
    %cst_5 = arith.constant 0.000000e+00 : f32
    %6 = vector.broadcast %cst_5 : f32 to vector<2x128xf32>
    %7 = arith.maximumf %5, %6 : vector<2x128xf32>
    %c0_6 = arith.constant 0 : index
    %c0_7 = arith.constant 0 : index
    %8 = vector.load %arg4[%c0_6, %c0_7] : memref<128x128xf32, #tpu.memory_space<vmem>>, vector<128x128xf32>
    %cst_8 = arith.constant dense<0.000000e+00> : vector<2x128xf32>
    %9 = tpu.matmul %7, %8, %cst_8 {dimension_numbers = #tpu.dot_dimension_numbers<[1], [0], [0], [1], [0, 0, 1, 1], [], []>} : vector<2x128xf32>, vector<128x128xf32>, vector<2x128xf32> -> vector<2x128xf32>
    %c0_9 = arith.constant 0 : index
    %c0_10 = arith.constant 0 : index
    %10 = vector.load %arg5[%c0_9, %c0_10] : memref<1x128xf32, #tpu.memory_space<vmem>>, vector<1x128xf32>
    %11 = vector.broadcast %10 : vector<1x128xf32> to vector<2x128xf32>
    %12 = arith.addf %9, %11 : vector<2x128xf32>
    %c0_11 = arith.constant 0 : index
    %c0_12 = arith.constant 0 : index
    %13 = vector.load %arg6[%c0_11, %c0_12] : memref<2x128xf32, #tpu.memory_space<vmem>>, vector<2x128xf32>
    tpu.vector_store %arg6[%c0_11, %c0_12], %12 {strides = array<i32>} : memref<2x128xf32, #tpu.memory_space<vmem>>, vector<2x128xf32>,
    return
  }
  func.func @transform_0(%arg0: i32) -> (i32, i32) {
    %c0_i32 = arith.constant 0 : i32
    %c0_i32_0 = arith.constant 0 : i32
    return %arg0, %c0_i32 : i32, i32
  }
  func.func @transform_1(%arg0: i32) -> (i32, i32) {
    %c0_i32 = arith.constant 0 : i32
    %c0_i32_0 = arith.constant 0 : i32
    %c0_i32_1 = arith.constant 0 : i32
    return %c0_i32, %c0_i32_0 : i32, i32
  }
  func.func @transform_2(%arg0: i32) -> (i32, i32) {
    %c0_i32 = arith.constant 0 : i32
    %c0_i32_0 = arith.constant 0 : i32
    %c0_i32_1 = arith.constant 0 : i32
    return %c0_i32, %c0_i32_0 : i32, i32
  }
  func.func @transform_3(%arg0: i32) -> (i32, i32) {
    %c0_i32 = arith.constant 0 : i32
    %c0_i32_0 = arith.constant 0 : i32
    %c0_i32_1 = arith.constant 0 : i32
    return %c0_i32, %c0_i32_0 : i32, i32
  }
  func.func @transform_4(%arg0: i32) -> (i32, i32) {
    %c0_i32 = arith.constant 0 : i32
    %c0_i32_0 = arith.constant 0 : i32
    %c0_i32_1 = arith.constant 0 : i32
    return %c0_i32, %c0_i32_0 : i32, i32
  }
  func.func @transform_5(%arg0: i32) -> (i32, i32) {
    %c0_i32 = arith.constant 0 : i32
    %c0_i32_0 = arith.constant 0 : i32
    return %arg0, %c0_i32 : i32, i32
  }
}

</mosaic_0001>

<bundles_post_ra>
// kernel: net_fnn_forward.1
= control target key start
LH: loop header
LB: loop body
LE: loop exit
PB: predicated region body
PF: predicated region fallthrough
CT: control target
= control target key end

     0   :  { %10 = vsyncpa [#allocation3], 0  ;;  %s334_s0 = inlined_call_operand.vmem [shape: f32[2,256], index: 0, kind: input, shape index: {}]   ;;  %s335_s1 = inlined_call_operand.hbm [shape: f32[256,128], index: 1, kind: input, shape index: {}]   ;;  %s336_s2 = inlined_call_operand.vmem [shape: f32[1,128], index: 2, kind: input, shape index: {}]   ;;  %s337_s3 = inlined_call_operand.hbm [shape: f32[128,128], index: 3, kind: input, shape index: {}]   ;;  %s338_s4 = inlined_call_operand.vmem [shape: f32[1,128], index: 4, kind: input, shape index: {}]   ;;  %s339_s5 = inlined_call_operand.hbm [shape: f32[2,128], index: 5, kind: output, shape index: {}]  }
   0x1   :  { %11 = vsyncpa [#allocation6], 0 }
   0x2   :  { %12 = vsyncpa [#allocation4], 0  ;;  %s19_s20 = sshll.u32 %s335_s1, 4  ;;  %s281_s21 = smov [#allocation2]   ;;  %s20_s20 = int_to_ptr.hbm [resolvable:$true] %s19_s20 }
   0x3   :  { %s21_s22 = sshll.u32 %s281_s21, 4  ;;  %s34_s25 = sshll.u32 %s337_s3, 4  ;;  %s22_s22 = int_to_ptr.vmem [resolvable:$true] %s21_s22  ;;  %s35_s25 = int_to_ptr.hbm [resolvable:$true] %s34_s25 }
   0x4   :  { %s282_s26 = smov 128   ;;  %s283_s27 = smov 8  }
   0x5   :  { %27 = dma.hbm_to_vmem [thread:$0]  %s20_s20, 4096, %s22_s22, [#allocation3], %s282_s26, %s282_s26, %s283_s27  }
   0x6   :  { %s284_s28 = smov [#allocation5]  }
   0x7   :  { %s36_s29 = sshll.u32 %s284_s28, 4  ;;  %s37_s29 = int_to_ptr.vmem [resolvable:$true] %s36_s29 }
   0x8   :  { %42 = dma.hbm_to_vmem [thread:$0]  %s35_s25, 2048, %s37_s29, [#allocation6], %s282_s26, %s282_s26, %s283_s27  }
   0x9   :  { %275 = dma.done.wait [#allocation3], 4096  }
   0xa   :  { %276 = vsyncadd [#allocation3], 4294963200 }
   0xb   :  { %277 = dma.done.wait [#allocation6], 2048  }
   0xc   :  { %278 = vsyncadd [#allocation6], 4294965248  ;;  %v69_v0 = vld [vmem:[#allocation2 + $0x78] sm:$0xff]  ;;  %v68_v1 = vld [vmem:[#allocation2 + $0x70] sm:$0xff]  ;;  %s285_s8 = smov [#allocation7]   ;;  %s185_s12 = sshll.u32 %s339_s5, 4  ;;  %s186_s12 = int_to_ptr.hbm [resolvable:$true] %s185_s12 }
   0xd   :  { %v85_v2 = vld [vmem:[#allocation2 + $0xf8] sm:$0xff]  ;;  %96 = vmatpush.msra.mxu0 %v69_v0  ;;  %v84_v3 = vld [vmem:[#allocation2 + $0xf0] sm:$0xff]  ;;  %v67_v4 = vld [vmem:[#allocation2 + $0x68] sm:$0xff]  ;;  %s183_s9 = sshll.u32 %s285_s8, 4  ;;  %s184_s9 = int_to_ptr.vmem [resolvable:$true] %s183_s9 }
   0xe   :  { %116 = vmatpush.msra.mxu1 %v85_v2  ;;  %v83_v5 = vld [vmem:[#allocation2 + $0xe8] sm:$0xff]  ;;  %v66_v6 = vld [vmem:[#allocation2 + $0x60] sm:$0xff]  ;;  %v65_v8 = vld [vmem:[#allocation2 + $0x58] sm:$0xff] }
   0xf   :  { %97 = vmatpush.msra.mxu0 %v68_v1  ;;  %v82_v7 = vld [vmem:[#allocation2 + $0xe0] sm:$0xff]  ;;  %v81_v9 = vld [vmem:[#allocation2 + $0xd8] sm:$0xff]  ;;  %v64_v10 = vld [vmem:[#allocation2 + $0x50] sm:$0xff] }
  0x10   :  { %117 = vmatpush.msra.mxu1 %v84_v3  ;;  %v80_v11 = vld [vmem:[#allocation2 + $0xd0] sm:$0xff]  ;;  %v63_v12 = vld [vmem:[#allocation2 + $0x48] sm:$0xff]  ;;  %v53_v14 = vld [vmem:[%s334_s0] sm:$0xf] }
  0x11   :  { %98 = vmatpush.msra.mxu0 %v67_v4  ;;  %v79_v13 = vld [vmem:[#allocation2 + $0xc8] sm:$0xff]  ;;  %91 = vst [vmem:[#allocation1] ss:$4 sm:$0xff] %v53_v14  ;;  %v152_v15 = vld [vmem:[#allocation5 + $0x78] sm:$0xff]  ;;  %v151_v16 = vld [vmem:[#allocation5 + $0x70] sm:$0xff] }
  0x12   :  { %118 = vmatpush.msra.mxu1 %v83_v5  ;;  %v62_v17 = vld [vmem:[#allocation2 + $0x40] sm:$0xff]  ;;  %157 = vmatpush.msra.mxu2 %v152_v15  ;;  %v150_v19 = vld [vmem:[#allocation5 + $0x68] sm:$0xff]  ;;  %v61_v20 = vld [vmem:[#allocation2 + $0x38] sm:$0xff] }
  0x13   :  { %99 = vmatpush.msra.mxu0 %v66_v6  ;;  %v78_v18 = vld [vmem:[#allocation2 + $0xc0] sm:$0xff]  ;;  %v77_v21 = vld [vmem:[#allocation2 + $0xb8] sm:$0xff]  ;;  %v60_v23 = vld [vmem:[#allocation2 + $0x30] sm:$0xff] }
  0x14   :  { %119 = vmatpush.msra.mxu1 %v82_v7  ;;  %158 = vmatpush.msra.mxu2 %v151_v16  ;;  %v149_v22 = vld [vmem:[#allocation5 + $0x60] sm:$0xff]  ;;  %v76_v24 = vld [vmem:[#allocation2 + $0xb0] sm:$0xff]  ;;  %v148_v25 = vld [vmem:[#allocation5 + $0x58] sm:$0xff] }
  0x15   :  { %100 = vmatpush.msra.mxu0 %v65_v8  ;;  %v59_v26 = vld [vmem:[#allocation2 + $0x28] sm:$0xff]  ;;  %v147_v28 = vld [vmem:[#allocation5 + $0x50] sm:$0xff]  ;;  %v58_v29 = vld [vmem:[#allocation2 + $0x20] sm:$0xff] }
  0x16   :  { %120 = vmatpush.msra.mxu1 %v81_v9  ;;  %159 = vmatpush.msra.mxu2 %v150_v19  ;;  %v75_v27 = vld [vmem:[#allocation2 + $0xa8] sm:$0xff]  ;;  %v74_v30 = vld [vmem:[#allocation2 + $0xa0] sm:$0xff]  ;;  %v57_v32 = vld [vmem:[#allocation2 + $0x18] sm:$0xff] }
  0x17   :  { %101 = vmatpush.msra.mxu0 %v64_v10  ;;  %v146_v31 = vld [vmem:[#allocation5 + $0x48] sm:$0xff]  ;;  %v73_v33 = vld [vmem:[#allocation2 + $0x98] sm:$0xff]  ;;  %v145_v34 = vld [vmem:[#allocation5 + $0x40] sm:$0xff] }
  0x18   :  { %121 = vmatpush.msra.mxu1 %v80_v11  ;;  %160 = vmatpush.msra.mxu2 %v149_v22  ;;  %v56_v35 = vld [vmem:[#allocation2 + $0x10] sm:$0xff]  ;;  %v144_v37 = vld [vmem:[#allocation5 + $0x38] sm:$0xff]  ;;  %v55_v38 = vld [vmem:[#allocation2 + $0x8] sm:$0xff] }
  0x19   :  { %102 = vmatpush.msra.mxu0 %v63_v12  ;;  %v72_v36 = vld [vmem:[#allocation2 + $0x90] sm:$0xff]  ;;  %v71_v39 = vld [vmem:[#allocation2 + $0x88] sm:$0xff]  ;;  %v54_v41 = vld [vmem:[#allocation2] sm:$0xff] }
  0x1a   :  { %122 = vmatpush.msra.mxu1 %v79_v13  ;;  %161 = vmatpush.msra.mxu2 %v148_v25  ;;  %v143_v40 = vld [vmem:[#allocation5 + $0x30] sm:$0xff]  ;;  %v70_v42 = vld [vmem:[#allocation2 + $0x80] sm:$0xff]  ;;  %v92_v43 = vld.sshfl [vmem:[#allocation1] sm:$0xff pattern:$0x73625140] }
  0x1b   :  { %103 = vmatpush.msra.mxu0 %v62_v17  ;;  %v93_v44 = vld.sshfl [vmem:[#allocation1 + $0x8] sm:$0xff pattern:$0x73625140]  ;;  %v142_v45 = vld [vmem:[#allocation5 + $0x28] sm:$0xff]  ;;  %v140_v47 = vld [vmem:[#allocation5 + $0x18] sm:$0xff] }
  0x1c   :  { %123 = vmatpush.msra.mxu1 %v78_v18  ;;  %162 = vmatpush.msra.mxu2 %v147_v28  ;;  %v141_v46 = vld [vmem:[#allocation5 + $0x20] sm:$0xff]  ;;  %v139_v48 = vld [vmem:[#allocation5 + $0x10] sm:$0xff]  ;;  %v138_v49 = vld [vmem:[#allocation5 + $0x8] sm:$0xff] }
  0x1d   :  { %104 = vmatpush.msra.mxu0 %v61_v20  ;;  %v137_v50 = vld [vmem:[#allocation5] sm:$0xff]  ;;  %v201_v51 = vld [vmem:[%s336_s2] ss:$0 sm:$0xff] }
  0x1e   :  { %124 = vmatpush.msra.mxu1 %v77_v21  ;;  %163 = vmatpush.msra.mxu2 %v146_v31  ;;  %v202_v57 = vld [vmem:[%s338_s4] ss:$0 sm:$0xff] }
  0x1f   :  { %105 = vmatpush.msra.mxu0 %v60_v23 }
  0x20   :  { %125 = vmatpush.msra.mxu1 %v76_v24  ;;  %164 = vmatpush.msra.mxu2 %v145_v34 }
  0x21   :  { %106 = vmatpush.msra.mxu0 %v59_v26 }
  0x22   :  { %126 = vmatpush.msra.mxu1 %v75_v27  ;;  %165 = vmatpush.msra.mxu2 %v144_v37 }
  0x23   :  { %107 = vmatpush.msra.mxu0 %v58_v29 }
  0x24   :  { %127 = vmatpush.msra.mxu1 %v74_v30  ;;  %166 = vmatpush.msra.mxu2 %v143_v40 }
  0x25   :  { %108 = vmatpush.msra.mxu0 %v57_v32 }
  0x26   :  { %128 = vmatpush.msra.mxu1 %v73_v33  ;;  %167 = vmatpush.msra.mxu2 %v142_v45 }
  0x27   :  { %109 = vmatpush.msra.mxu0 %v56_v35 }
  0x28   :  { %129 = vmatpush.msra.mxu1 %v72_v36  ;;  %168 = vmatpush.msra.mxu2 %v141_v46 }
  0x29   :  { %110 = vmatpush.msra.mxu0 %v55_v38 }
  0x2a   :  { %130 = vmatpush.msra.mxu1 %v71_v39  ;;  %169 = vmatpush.msra.mxu2 %v140_v47 }
  0x2b   :  { %111 = vmatpush.msra.mxu0 %v54_v41 }
  0x2c   :  { %131 = vmatpush.msra.mxu1 %v70_v42  ;;  %112 = vmatmul.f32.vlgmr.msra.gmra.mxu0 %v92_v43 }
  0x2d   :  { %132 = vmatmul.f32.vlgmr.msra.gmra.mxu1 %v93_v44  ;;  %170 = vmatpush.msra.mxu2 %v139_v48 }
  0x2f   :  { %171 = vmatpush.msra.mxu2 %v138_v49 }
  0x31   :  { %172 = vmatpush.msra.mxu2 %v137_v50 }
  0xa9   :  { %v113_v52 = vpop.f32.mrf.mxu0 }
  0xaa   :  { %v133_v53 = vpop.f32.mrf.mxu1  ;;  %v114_v54 = vadd.f32 %v201_v51, %v113_v52 }
  0xac   :  { %v134_v55 = vadd.f32 %v133_v53, %v114_v54 }
  0xae   :  { %v136_v56 = vmax.f32 %v134_v55, 0.0 }
  0xb0   :  { %173 = vmatmul.f32.vlgmr.msra.gmra.mxu2 %v136_v56 }
 0x133   :  { %v174_v58 = vpop.f32.mrf.mxu2 }
 0x134   :  { %v175_v59 = vadd.f32 %v202_v57, %v174_v58 }
 0x136   :  { %177 = vst [vmem:[#allocation7] sm:$0x3] %v175_v59 }
 0x137   :  { %188 = dma.vmem_to_hbm [thread:$0]  %s184_s9, 32, %s186_s12, [#allocation4]  }
 0x138   :  { %279 = dma.done.wait [#allocation4], 32  }
 0x139   :  { %280 = vsyncadd [#allocation4], 4294967264 }
 0x13a   :  { %193 = vsyncpa [#allocation3], 1 }
 0x13b   :  { %194 = vsyncpa [#allocation6], 1 }
 0x13c   :  { %195 = vsyncpa [#allocation4], 1 }

</bundles_post_ra>
